<compile_context>
chip_gen: v5e
topology: v5e:2x2
jax: 0.10.0
libtpu: 0.0.40
codegen_flags: <defaults>
</compile_context>

<pallas_src>
import functools

import jax
import jax.numpy as jnp
from jax.experimental import pallas as pl
from jax.experimental.pallas import tpu as pltpu

LANE = 128
SUBLANE = 8


def _focal_kernel(x_ref, t_ref, out_ref, *, alpha, gamma, n_elems,
                  tile_rows, tiles_per_core, mask_padding):
    c = pl.program_id(0)   # parallel (megacore) axis
    k = pl.program_id(1)   # sequential reduction axis

    @pl.when(k == 0)
    def _():
        out_ref[...] = jnp.zeros_like(out_ref)

    x = x_ref[...].astype(jnp.float32)
    t = jnp.round(t_ref[...].astype(jnp.float32))

    # Shared transcendental: e = exp(-|x|).
    e = jnp.exp(-jnp.abs(x))

    # Stable BCE-with-logits, identical to the reference's max_val form:
    #   x - x*t + max(-x,0) + log(exp(-max_val) + exp(-x - max_val))
    #     == max(x,0) - x*t + log(1 + exp(-|x|))
    bce = jnp.maximum(x, 0.0) - x * t + jnp.log(1.0 + e)

    # sigmoid(x) = where(x>=0, 1, e) / (1 + e)   (reuses e; no extra exp)
    sig = jnp.where(x >= 0.0, 1.0, e) / (1.0 + e)

    # invprobs = log(clip(p, 1e-8, 1)); focal factor = exp(gamma*invprobs) = clip(p)**gamma
    p = jnp.clip(1.0 - t + sig * (t * 2.0 - 1.0), 1e-8, 1.0)
    g_int = int(gamma)
    if float(gamma) == float(g_int) and 0 <= g_int <= 4:
        focal = jnp.ones_like(p)
        for _ in range(g_int):          # gamma=2 -> p*p: pure VPU, no exp/log
            focal = focal * p
    else:
        focal = jnp.exp(gamma * jnp.log(p))

    weights = (1.0 - t * 2.0) * (1.0 - alpha) + t
    loss = weights * focal * bce

    if mask_padding:
        row_ids = jax.lax.broadcasted_iota(jnp.int32, loss.shape, 0)
        lane_ids = jax.lax.broadcasted_iota(jnp.int32, loss.shape, 1)
        tile_idx = c * tiles_per_core + k
        flat_idx = (tile_idx * tile_rows + row_ids) * LANE + lane_ids
        loss = jnp.where(flat_idx < n_elems, loss, 0.0)

    # vreg-shaped accumulation: (tile_rows,128) -> (8,128) with pure VPU adds.
    out_ref[...] += loss.reshape(-1, SUBLANE, LANE).sum(axis=0)


def focal_loss(x, target, *, alpha, gamma, tile_rows=1024, num_cores=2):
    """x, target: same shape (any rank, e.g. NCHW). Returns scalar f32 mean loss."""
    assert x.shape == target.shape, "Target size must equal input size"
    n_elems = x.size

    rows_needed = pl.cdiv(n_elems, LANE)
    # Shrink tile for tiny inputs so we don't over-pad; keep multiple of 8 sublanes.
    tile_rows = int(min(tile_rows,
                        max(SUBLANE, pl.cdiv(rows_needed, num_cores * SUBLANE) * SUBLANE)))

    chunk = num_cores * tile_rows * LANE
    padded = int(pl.cdiv(n_elems, chunk)) * chunk
    pad = padded - n_elems

    # Keep original dtypes (no forced f32 upcast in HBM); cast inside the kernel.
    x_flat = x.reshape(-1)
    t_flat = target.reshape(-1)
    if pad:
        x_flat = jnp.pad(x_flat, (0, pad))
        t_flat = jnp.pad(t_flat, (0, pad))

    rows = padded // LANE
    x2 = x_flat.reshape(rows, LANE)
    t2 = t_flat.reshape(rows, LANE)

    tiles_per_core = rows // (tile_rows * num_cores)
    grid = (num_cores, tiles_per_core)

    kernel = functools.partial(
        _focal_kernel,
        alpha=float(alpha), gamma=float(gamma), n_elems=n_elems,
        tile_rows=tile_rows, tiles_per_core=tiles_per_core,
        mask_padding=bool(pad),
    )

    in_map = lambda c, k: (c * tiles_per_core + k, 0)
    partials = pl.pallas_call(
        kernel,
        out_shape=jax.ShapeDtypeStruct((num_cores * SUBLANE, LANE), jnp.float32),
        grid_spec=pltpu.PrefetchScalarGridSpec(
            num_scalar_prefetch=0,
            grid=grid,
            in_specs=[
                pl.BlockSpec((tile_rows, LANE), in_map),
                pl.BlockSpec((tile_rows, LANE), in_map),
            ],
            out_specs=pl.BlockSpec((SUBLANE, LANE), lambda c, k: (c, 0)),
        ),
        compiler_params=pltpu.CompilerParams(
            dimension_semantics=("parallel", "arbitrary"),
        ),
    )(x2, t2)

    # Combine the per-core lane-dense partial sums; divide by the TRUE count.
    return jnp.sum(partials) / jnp.float32(n_elems)


def _focal_loss_ref(x, target, alpha, gamma):
    x = x.astype(jnp.float32)
    t = jnp.round(target.astype(jnp.float32))
    max_val = jnp.maximum(-x, 0.0)
    loss = x - x * t + max_val + jnp.log(jnp.exp(-max_val) + jnp.exp(-x - max_val))
    invprobs = jnp.log(jnp.clip(1.0 - t + jax.nn.sigmoid(x) * (t * 2.0 - 1.0), 1e-8, 1.0))
    weights = (1.0 - t * 2.0) * (1.0 - alpha) + t
    return jnp.mean(weights * jnp.exp(invprobs * gamma) * loss)


if __name__ == "__main__":
    # Deterministic "module parameters" (scalars in __init__).
    alpha = 0.25
    gamma = 2.0

    key = jax.random.PRNGKey(0)
    k1, k2, k3, k4 = jax.random.split(key, 4)

    # NCHW segmentation logits + binary target mask (divides evenly into tiles).
    x = jax.random.normal(k1, (2, 4, 16, 16), dtype=jnp.float32)
    target = jax.random.bernoulli(k2, p=0.3, shape=(2, 4, 16, 16)).astype(jnp.float32)
    out = focal_loss(x, target, alpha=alpha, gamma=gamma)
    out = jax.block_until_ready(out)
    ref = _focal_loss_ref(x, target, alpha, gamma)
    assert jnp.allclose(out, ref, rtol=2e-5, atol=1e-6), (out, ref)

    # Ragged shape (not a multiple of 128) to exercise the padding/mask path.
    xr = jax.random.normal(k3, (2, 3, 17, 19), dtype=jnp.float32)
    tr = jax.random.bernoulli(k4, p=0.3, shape=(2, 3, 17, 19)).astype(jnp.float32)
    out_r = jax.block_until_ready(focal_loss(xr, tr, alpha=alpha, gamma=gamma))
    ref_r = _focal_loss_ref(xr, tr, alpha, gamma)
    assert jnp.allclose(out_r, ref_r, rtol=2e-5, atol=1e-6), (out_r, ref_r)

    print("KERNEL_OK")
</pallas_src>

<mosaic_0001>
module attributes {stable_mosaic.version = 11 : i64} {
  func.func @_focal_kernel(%arg0: i32, %arg1: i32, %arg2: memref<8x128xf32, #tpu.memory_space<vmem>>, %arg3: memref<8x128xf32, #tpu.memory_space<vmem>>, %arg4: memref<8x128xf32, #tpu.memory_space<vmem>>) attributes {dimension_semantics = [#tpu.dimension_semantics<parallel>, #tpu.dimension_semantics<arbitrary>], iteration_bounds = array<i64: 2, 1>, scalar_prefetch = 0 : i64, scratch_operands = 0 : i64, tpu.core_type = #tpu.core_type<tc>, window_params = [{transform_indices = @transform_0, window_bounds = array<i64: 8, 128>}, {transform_indices = @transform_1, window_bounds = array<i64: 8, 128>}, {transform_indices = @transform_2, window_bounds = array<i64: 8, 128>}]} {
    %c0_i32 = arith.constant 0 : i32
    %0 = arith.cmpi eq, %arg1, %c0_i32 : i32
    %1 = arith.extui %0 : i1 to i32
    %c0_i32_0 = arith.constant 0 : i32
    %2 = arith.cmpi ne, %1, %c0_i32_0 : i32
    scf.if %2 {
      %cst_23 = arith.constant 0.000000e+00 : f32
      %54 = vector.broadcast %cst_23 : f32 to vector<8x128xf32>
      %c0_24 = arith.constant 0 : index
      %c0_25 = arith.constant 0 : index
      %55 = vector.load %arg4[%c0_24, %c0_25] : memref<8x128xf32, #tpu.memory_space<vmem>>, vector<8x128xf32>
      tpu.vector_store %arg4[%c0_24, %c0_25], %54 {strides = array<i32>} : memref<8x128xf32, #tpu.memory_space<vmem>>, vector<8x128xf32>,
    } else {
    }
    %c0 = arith.constant 0 : index
    %c0_1 = arith.constant 0 : index
    %3 = vector.load %arg2[%c0, %c0_1] : memref<8x128xf32, #tpu.memory_space<vmem>>, vector<8x128xf32>
    %c0_2 = arith.constant 0 : index
    %c0_3 = arith.constant 0 : index
    %4 = vector.load %arg3[%c0_2, %c0_3] : memref<8x128xf32, #tpu.memory_space<vmem>>, vector<8x128xf32>
    %5 = math.roundeven %4 : vector<8x128xf32>
    %6 = math.absf %3 : vector<8x128xf32>
    %cst = arith.constant 0.000000e+00 : f32
    %7 = vector.broadcast %cst : f32 to vector<8x128xf32>
    %8 = arith.subf %7, %6 : vector<8x128xf32>
    %9 = math.exp %8 : vector<8x128xf32>
    %cst_4 = arith.constant 0.000000e+00 : f32
    %10 = vector.broadcast %cst_4 : f32 to vector<8x128xf32>
    %11 = arith.maximumf %3, %10 : vector<8x128xf32>
    %12 = arith.mulf %3, %5 : vector<8x128xf32>
    %13 = arith.subf %11, %12 : vector<8x128xf32>
    %cst_5 = arith.constant 1.000000e+00 : f32
    %14 = vector.broadcast %cst_5 : f32 to vector<8x128xf32>
    %15 = arith.addf %14, %9 : vector<8x128xf32>
    %16 = math.log %15 : vector<8x128xf32>
    %17 = arith.addf %13, %16 : vector<8x128xf32>
    %cst_6 = arith.constant 0.000000e+00 : f32
    %18 = vector.broadcast %cst_6 : f32 to vector<8x128xf32>
    %19 = arith.cmpf oge, %3, %18 : vector<8x128xf32>
    %cst_7 = arith.constant 1.000000e+00 : f32
    %20 = vector.broadcast %cst_7 : f32 to vector<8x128xf32>
    %21 = arith.select %19, %20, %9 : vector<8x128xi1>, vector<8x128xf32>
    %cst_8 = arith.constant 1.000000e+00 : f32
    %22 = vector.broadcast %cst_8 : f32 to vector<8x128xf32>
    %23 = arith.addf %22, %9 : vector<8x128xf32>
    %24 = arith.divf %21, %23 : vector<8x128xf32>
    %cst_9 = arith.constant 1.000000e+00 : f32
    %25 = vector.broadcast %cst_9 : f32 to vector<8x128xf32>
    %26 = arith.subf %25, %5 : vector<8x128xf32>
    %cst_10 = arith.constant 2.000000e+00 : f32
    %27 = vector.broadcast %cst_10 : f32 to vector<8x128xf32>
    %28 = arith.mulf %5, %27 : vector<8x128xf32>
    %cst_11 = arith.constant 1.000000e+00 : f32
    %29 = vector.broadcast %cst_11 : f32 to vector<8x128xf32>
    %30 = arith.subf %28, %29 : vector<8x128xf32>
    %31 = arith.mulf %24, %30 : vector<8x128xf32>
    %32 = arith.addf %26, %31 : vector<8x128xf32>
    %cst_12 = arith.constant 9.99999993E-9 : f32
    %cst_13 = arith.constant 1.000000e+00 : f32
    %33 = vector.broadcast %cst_12 : f32 to vector<8x128xf32>
    %34 = arith.maximumf %33, %32 : vector<8x128xf32>
    %35 = vector.broadcast %cst_13 : f32 to vector<8x128xf32>
    %36 = arith.minimumf %35, %34 : vector<8x128xf32>
    %cst_14 = arith.constant 1.000000e+00 : f32
    %37 = vector.broadcast %cst_14 : f32 to vector<8x128xf32>
    %38 = arith.mulf %37, %36 : vector<8x128xf32>
    %39 = arith.mulf %38, %36 : vector<8x128xf32>
    %cst_15 = arith.constant 2.000000e+00 : f32
    %40 = vector.broadcast %cst_15 : f32 to vector<8x128xf32>
    %41 = arith.mulf %5, %40 : vector<8x128xf32>
    %cst_16 = arith.constant 1.000000e+00 : f32
    %42 = vector.broadcast %cst_16 : f32 to vector<8x128xf32>
    %43 = arith.subf %42, %41 : vector<8x128xf32>
    %cst_17 = arith.constant 7.500000e-01 : f32
    %44 = vector.broadcast %cst_17 : f32 to vector<8x128xf32>
    %45 = arith.mulf %43, %44 : vector<8x128xf32>
    %46 = arith.addf %45, %5 : vector<8x128xf32>
    %47 = arith.mulf %46, %39 : vector<8x128xf32>
    %48 = arith.mulf %47, %17 : vector<8x128xf32>
    %c0_18 = arith.constant 0 : index
    %c0_19 = arith.constant 0 : index
    %49 = vector.load %arg4[%c0_18, %c0_19] : memref<8x128xf32, #tpu.memory_space<vmem>>, vector<8x128xf32>
    %50 = vector.shape_cast %48 : vector<8x128xf32> to vector<1x8x128xf32>
    %cst_20 = arith.constant dense<0.000000e+00> : vector<8x128xf32>
    %51 = vector.multi_reduction <add>, %50, %cst_20 [0] : vector<1x8x128xf32> to vector<8x128xf32>
    %52 = arith.addf %49, %51 : vector<8x128xf32>
    %c0_21 = arith.constant 0 : index
    %c0_22 = arith.constant 0 : index
    %53 = vector.load %arg4[%c0_21, %c0_22] : memref<8x128xf32, #tpu.memory_space<vmem>>, vector<8x128xf32>
    tpu.vector_store %arg4[%c0_21, %c0_22], %52 {strides = array<i32>} : memref<8x128xf32, #tpu.memory_space<vmem>>, vector<8x128xf32>,
    return
  }
  func.func @transform_0(%arg0: i32, %arg1: i32) -> (i32, i32) {
    %c1_i32 = arith.constant 1 : i32
    %0 = arith.muli %arg0, %c1_i32 : i32
    %1 = arith.addi %0, %arg1 : i32
    %c0_i32 = arith.constant 0 : i32
    %c0_i32_0 = arith.constant 0 : i32
    return %1, %c0_i32 : i32, i32
  }
  func.func @transform_1(%arg0: i32, %arg1: i32) -> (i32, i32) {
    %c1_i32 = arith.constant 1 : i32
    %0 = arith.muli %arg0, %c1_i32 : i32
    %1 = arith.addi %0, %arg1 : i32
    %c0_i32 = arith.constant 0 : i32
    %c0_i32_0 = arith.constant 0 : i32
    return %1, %c0_i32 : i32, i32
  }
  func.func @transform_2(%arg0: i32, %arg1: i32) -> (i32, i32) {
    %c0_i32 = arith.constant 0 : i32
    %c0_i32_0 = arith.constant 0 : i32
    return %arg0, %c0_i32 : i32, i32
  }
}

</mosaic_0001>

<bundles_post_ra>
// kernel: tpu_custom_call.1
= control target key start
LH: loop header
LB: loop body
LE: loop exit
PB: predicated region body
PF: predicated region fallthrough
CT: control target
= control target key end

     0   :  { %7 = vsyncpa [#allocation3], 0  ;;  %s787_s0 = inlined_call_operand.hbm [shape: f32[16,128], index: 0, kind: input, shape index: {}]   ;;  %s788_s1 = inlined_call_operand.hbm [shape: f32[16,128], index: 1, kind: input, shape index: {}]   ;;  %s789_s2 = inlined_call_operand.hbm [shape: f32[16,128], index: 2, kind: output, shape index: {}]  }
   0x1   :  { %9 = vsyncpa [#allocation3 + $0x1], 0 }
   0x2   :  { %10 = vsyncpa [#allocation6], 0 }
   0x3   :  { %12 = vsyncpa [#allocation6 + $0x1], 0 }
   0x4   :  { %13 = vsyncpa [#allocation4], 0 }
   0x5   :  { %15 = vsyncpa [#allocation4 + $0x1], 0  ;;  %s654_s9 = smov 0   ;;  %s656_s10 = smov 0  }
   0x6   :  { %s658_s11 = smov 0   ;;  %s660_s12 = smov 0  }
   0x7   :  { %s662_s13 = smov 0   ;;  %s664_s14 = smov 0  }
   0x8 LB: > { %s392_s15 = sadd.s32 4294967295, %s637_s14   ;;  %s393_s16 = sadd.s32 4294967294, %s637_s14   ;;  %s637_s14 = sphi %s664_s14, %s21_s14   ;;  %s633_s13 = sphi %s662_s13, %s798_s13   ;;  %s629_s12 = sphi %s660_s12, %s797_s12   ;;  %s625_s11 = sphi %s658_s11, %s796_s11   ;;  %s621_s10 = sphi %s656_s10, %s795_s10   ;;  %s617_s9 = sphi %s654_s9, %s794_s9  }
   0x9   : > { %s33_s17 = sadd.s32 1, %s633_s13  ;;  %s42_s18 = sadd.s32 1, %s625_s11 }
   0xa   : > { %p35_p0 = scmp.ge.s32.totalorder %s33_s17, 2  ;;  %p49_p1 = scmp.ne.s32.totalorder %s625_s11, %s621_s10 }
   0xb   : > { %p50_p2 = scmp.eq.s32.totalorder %s637_s14, 0  ;;  %p55_p3 = scmp.ne.s32.totalorder %s621_s10, %s617_s9 }
   0xc   : > { %s800_s17 = smov (%p35_p0, %s33_s17), 0  ;;  %p56_p5 = scmp.eq.s32.totalorder %s392_s15, 0 }
   0xd   : > { %p695_p4 = por %p50_p2, %p49_p1  ;;  %s39_s20 = ssub.s32 %s633_s13, %s800_s17 }
   0xe   : > { %p107_p6 = scmp.eq.s32.totalorder %s392_s15, 1  ;;  %p40_p7 = scmp.eq.s32.totalorder %s39_s20, 0 }
   0xf   : > { %p701_p8 = por %p56_p5, %p55_p3  ;;  %p113_p10 = scmp.eq.s32.totalorder %s393_s16, 1 }
  0x10   : > { %p705_p9 = por %p107_p6, %p49_p1  ;;  %p395_p12 = scmp.ge.s32.totalorder %s637_s14, 2 }
  0x11   : > { %s710_s23 = scalar_select %p40_p7, %s625_s11, %s42_s18  }
  0x12   : > { %p712_p11 = por %p113_p10, %p55_p3  ;;  %p434_p13 = scmp.lt.s32.totalorder %s637_s14, 2 }
  0x13   : > { %s133_s25 = sand.u32 1, %s625_s11   ;;  %s397_s27 = sshll.u32 %s633_s13, 3 }
  0x14   : > { %s396_s26 = sshll.u32 %s133_s25, 3  ;;  %s142_s30 = scalar_lea.hbm %s787_s0, %s397_s27 }
  0x15   : > { %s137_s3 = scalar_lea.vmem [#allocation2], %s396_s26  ;;  %s144_s5 = sshll.u32 %s142_s30, 4  ;;  %s145_s5 = int_to_ptr.hbm [resolvable:$true] %s144_s5 }
  0x16   : > { %s146_s4 = sshll.u32 %s137_s3, 4  ;;  %p424_p0 = pnand %p434_p13, %p695_p4  ;;  %s147_s4 = int_to_ptr.vmem [resolvable:$true] %s146_s4 }
  0x17   : > { %p400_p1 = scmp.ge.s32.totalorder %s637_s14, 1  ;;  %p171_p2 = scmp.lt.s32.totalorder %s637_s14, 3 }
  0x18   : > { %s134_s6 = scalar_lea.sflag [#allocation3], %s133_s25  ;;  %s162_s15 = scalar_lea.hbm %s788_s1, %s397_s27 }
  0x19   : > { %426 = dma.hbm_to_vmem [thread:$0]  (!%p424_p0), %s145_s5, 128, %s147_s4, %s134_s6  }
  0x1a   : > { %p172_p3 = pnand %p400_p1, %p171_p2  ;;  %s157_s16 = scalar_lea.vmem [#allocation5], %s396_s26 }
  0x1b   : > { %s166_s18 = sshll.u32 %s157_s16, 4  ;;  %s164_s20 = sshll.u32 %s162_s15, 4  ;;  %s167_s18 = int_to_ptr.vmem [resolvable:$true] %s166_s18  ;;  %s165_s20 = int_to_ptr.hbm [resolvable:$true] %s164_s20 }
  0x1c   : > { %s154_s28 = scalar_lea.sflag [#allocation6], %s133_s25  ;;  %175 = sbr.rel (%p172_p3) target bundleno = 88 (0x58), region = 28 }
  0x1d   : > { %429 = dma.hbm_to_vmem [thread:$0]  (!%p424_p0), %s165_s20, 128, %s167_s18, %s154_s28  }
  0x1e   : > { %s731_s19 = sand.u32 (!%p172_p3), 1, %s621_s10  }
  0x1f   : > { %s734_s29 = sshll.u32 (!%p172_p3), %s731_s19, 3  ;;  %s178_s30 = scalar_lea.sflag (!%p172_p3), [#allocation3], %s731_s19 }
  0x20   : > { %s181_s3 = scalar_lea.vmem (!%p172_p3), [#allocation2], %s734_s29 }
  0x21   : > { %604 = dma.done.wait (%p701_p8), %s178_s30, 128  }
  0x22   : > { %606 = vsyncadd (%p701_p8), %s178_s30, 4294967168  ;;  %s188_s25 = scalar_lea.sflag [#allocation6], %s731_s19  ;;  %s191_s26 = scalar_lea.vmem [#allocation5], %s734_s29 }
  0x23   : > { %608 = dma.done.wait (%p701_p8), %s188_s25, 128  }
  0x24   : > { %610 = vsyncadd (%p701_p8), %s188_s25, 4294967168  ;;  %v225_v0 = vld [vmem:[%s181_s3] sm:$0xff]  ;;  %v226_v4 = vld [vmem:[%s191_s26] sm:$0xff]  ;;  %s406_s21 = sshll.u32 %s629_s12, 3  ;;  %s217_s6 = scalar_lea.vmem [#allocation7], %s734_s29 }
  0x25   : > { %v228_v1 = vand.u32 2147483647, %v225_v0  ;;  %v411_v5 = vcvt.f32.s32 %v226_v4  ;;  %v414_v10 = vand.u32 2147483648, %v226_v4  ;;  %v409_v11 = vand.u32 2147483647, %v226_v4  ;;  %s284_s5 = scalar_lea.hbm %s789_s2, %s406_s21  ;;  %s286_s7 = sshll.u32 %s217_s6, 4  ;;  %s287_s7 = int_to_ptr.vmem [resolvable:$true] %s286_s7 }
  0x26   : > { %vm239_vm3 = vcmp.ge.f32.partialorder %v225_v0, 0.0  ;;  %v232_v30 = vmax.f32 %v225_v0, 0.0  ;;  %s288_s8 = sshll.u32 %s284_s5, 4  ;;  %s274_s15 = scalar_lea.sflag [#allocation4], %s731_s19  ;;  %s289_s8 = int_to_ptr.hbm [resolvable:$true] %s288_s8 }
  0x27   : > { %v229_v2 = vsub.f32 0.0, %v228_v1  ;;  %v412_v7 = vcvt.s32.f32 %v411_v5  ;;  %vm410_vm0 = vcmp.lt.f32.partialorder %v409_v11, 8388608.0  ;;  %s565_s16 = sshra.s32 %s289_s8, 4  ;;  %s571_s28 = scalar_lea.hbm %s789_s2, 16  ;;  %s566_s16 = int_to_ptr.hbm [resolvable:$true] %s565_s16 }
  0x28   : > { %s567_s12 = scalar_lea.hbm %s566_s16, 8  ;;  %p572_p7 = scmp.lt.s32.totalorder %s566_s16, %s789_s2 }
  0x29   : > { %v230_v3 = vmul.f32 1.442695, %v229_v2  ;;  %v413_v9 = vand.u32 2147483647, %v412_v7  ;;  %p568_p4 = scmp.ne.s32.totalorder %s566_s16, %s567_s12  ;;  %p573_p8 = scmp.lt.s32.totalorder %s571_s28, %s567_s12 }
  0x2b   : > { %485 = vpow2.f32 %v230_v3  ;;  %v415_v12 = vor.u32 %v414_v10, %v413_v9  ;;  %p569_p5 = pnand %p568_p4, %p705_p9  ;;  %p574_p10 = por %p573_p8, %p572_p7 }
  0x2d   : > { %v416_v15 = vsel %vm410_vm0, %v415_v12, %v226_v4  ;;  %p570_p6 = pneg %p569_p5 }
  0x2e   : > { %v257_v20 = vmul.f32 2.0, %v416_v15  ;;  %v256_v28 = vsub.f32 1.0, %v416_v15  ;;  %v233_v31 = vmul.f32 %v416_v15, %v225_v0 }
  0x2f   : > { %p575_p13 = pnand %p574_p10, %p570_p6 }
  0x30   : > { %v404_v25 = vadd.f32 -1.0, %v257_v20  ;;  %v264_v29 = vsub.f32 1.0, %v257_v20  ;;  %v234_v36 = vsub.f32 %v232_v30, %v233_v31 }
  0x31   : > { %v486_v6 = vpop.eup %485 }
  0x32   : > { %v235_v8 = vadd.f32 1.0, %v486_v6  ;;  %v240_v23 = vsel %vm239_vm3, 1.0, %v486_v6  ;;  %v265_v35 = vmul.f32 0.75, %v264_v29 }
  0x34   : > { %487 = vrcp.f32 %v235_v8  ;;  %v252_v16 = vand.u32 2147483648, %v235_v8  ;;  %vm246_vm1 = vweird.f32 %v235_v8  ;;  %v250_v18 = vand.u32 2147483647, %v235_v8 }
  0x35   : > { %489 = vlog2.f32 %v235_v8  ;;  %v266_v40 = vadd.f32 %v416_v15, %v265_v35 }
  0x36   : > { %v253_v21 = vor.u32 1.1754944e-38, %v252_v16  ;;  %vm251_vm5 = vcmp.eq.f32.partialorder %v250_v18, 8.507059e+37 }
  0x3a   : > { %v488_v13 = vpop.eup %487 }
  0x3b   : > { %v242_v14 = vmul.f32 %v488_v13, %v235_v8  ;;  %vm247_vm2 = vweird.f32 %v488_v13  ;;  %v490_v33 = vpop.eup %489 }
  0x3c   : > { %vm248_vm4 = vmor %vm246_vm1, %vm247_vm2  ;;  %v237_v37 = vmul.f32 0.6931472, %v490_v33 }
  0x3d   : > { %v243_v17 = vsub.f32 1.0, %v242_v14 }
  0x3e   : > { %v238_v41 = vadd.f32 %v237_v37, %v234_v36 }
  0x3f   : > { %v244_v19 = vmul.f32 %v488_v13, %v243_v17 }
  0x41   : > { %v245_v22 = vadd.f32 %v488_v13, %v244_v19 }
  0x43   : > { %v249_v24 = vsel %vm248_vm4, %v488_v13, %v245_v22 }
  0x44   : > { %v254_v26 = vsel %vm251_vm5, %v253_v21, %v249_v24 }
  0x45   : > { %v255_v27 = vmul.f32 %v254_v26, %v240_v23 }
  0x47   : > { %v259_v32 = vmul.f32 %v404_v25, %v255_v27 }
  0x49   : > { %v260_v34 = vadd.f32 %v259_v32, %v256_v28 }
  0x4b   : > { %v261_v38 = vmax.f32 %v260_v34, 1e-08 }
  0x4d   : > { %v262_v39 = vmin.f32 %v261_v38, 1.0 }
  0x4f   : > { %v263_v42 = vmul.f32 %v262_v39, %v262_v39 }
  0x51   : > { %v267_v43 = vmul.f32 %v266_v40, %v263_v42 }
  0x53   : > { %v268_v44 = vmul.f32 %v267_v43, %v238_v41 }
  0x55   : > { %272 = vst [vmem:[%s217_s6] sm:$0xff] %v268_v44 }
  0x56   : > { %578 = shalt.err (!%p575_p13)
}
  0x57   : > { %421 = dma.vmem_to_hbm [thread:$0]  (%p705_p9), %s287_s7, 128, %s289_s8, %s274_s15  }
  0x58 PF: > { %s300_s19 = sand.u32 1, %s617_s9   ;;  %p431_p0 = pnand %p395_p12, %p712_p11 }
  0x59   : > { %s301_s3 = scalar_lea.sflag [#allocation4], %s300_s19 }
  0x5a   : > { %p432_p1 = pneg %p431_p0 }
  0x5c   : > { %612 = dma.done.wait (%p432_p1), %s301_s3, 128  }
  0x5d   : > { %614 = vsyncadd (%p432_p1), %s301_s3, 4294967168  ;;  %s21_s14 = sadd.s32 1, %s637_s14   ;;  %s794_s9 = smov %s621_s10 }
  0x5e   : > { %p18_p2 = scmp.ge.s32.totalorder %s21_s14, 4   ;;  %s795_s10 = smov %s625_s11 }
  0x5f   : > { %s796_s11 = smov %s710_s23  ;;  %s797_s12 = smov %s633_s13 }
  0x60   : > { %s798_s13 = smov %s800_s17  ;;  %20 = sbr.rel (!%p18_p2) target bundleno = 8 (0x8), region = 90 }
  0x65   :  { %307 = vsyncpa [#allocation3], 1 }
  0x66   :  { %309 = vsyncpa [#allocation3 + $0x1], 1 }
  0x67   :  { %310 = vsyncpa [#allocation6], 1 }
  0x68   :  { %312 = vsyncpa [#allocation6 + $0x1], 1 }
  0x69   :  { %313 = vsyncpa [#allocation4], 1 }
  0x6a   :  { %315 = vsyncpa [#allocation4 + $0x1], 1 }

</bundles_post_ra>
